<compile_context>
chip_gen: v6e
topology: v6e:2x2x1
jax: 0.10.0
libtpu: 0.0.40
codegen_flags: <defaults>
</compile_context>

<pallas_src>
import functools
import math

import jax
import jax.numpy as jnp
from jax.experimental import pallas as pl
from jax.experimental.pallas import tpu as pltpu

ALPHA = 0.5
GAMMA = 1.0
EPS = 1e-6


def _round_up(x, m):
    return ((x + m - 1) // m) * m


def _cdiv(a, b):
    return (a + b - 1) // b


def _triplet_kernel(lhs_ref, ppT_ref, pnT_ref, out_ref, acc_ref, *,
                    gamma, eps, shift, nu, nn, tr, tiles_per_split, col_tile):
    """One grid step over one row tile of the stacked (utt_pos, utt_neg) input.

    lhs_ref : (2, tr, D)  -- [0]=utt_pos tile, [1]=utt_neg tile (zero padded)
    ppT_ref : (D, Np)     -- row-normalized per_pos, transposed (resident)
    pnT_ref : (D, Nm)     -- row-normalized per_neg, transposed (resident)
    out_ref : (1, 6) SMEM -- per parallel-slot partial sums (written at i==last)
    acc_ref : (6,)  SMEM  -- [sum_e_p2p, sum_es_p2p, sum_e_n2p, sum_es_n2p,
                              sum_e_p2n, sum_es_p2n]
    """
    c = pl.program_id(0)
    i = pl.program_id(1)
    last = pl.num_programs(1) - 1
    tile0 = (c * tiles_per_split + i) * tr   # first global LHS row of this tile

    @pl.when(i == 0)
    def _init():
        for k in range(6):
            acc_ref[k] = jnp.float32(0.0)

    def normalize_half(h):
        # O(tr*D) row scaling instead of an O(Na*Nb) clamp+divide on the
        # similarity matrix.  Deliberate deviation from the reference: eps
        # clamps each row norm (not the norm *product*); identical except for
        # near-zero rows, and an exactly-zero (padded) row still yields s == 0.
        x = lhs_ref[h].astype(jnp.float32)                        # (tr, D)
        ssq = jnp.sum(x * x, axis=1, keepdims=True)
        inv = jax.lax.rsqrt(jnp.maximum(ssq, eps * eps)) * gamma  # gamma folded
        return (x * inv).astype(lhs_ref.dtype)

    def accumulate(lhs_half, rhsT_ref, e_slot, es_slot):
        # Column-tiled matmul + online exp-sums: f32 temporaries bounded at
        # (tr, col_tile) regardless of persona count.
        ncol = rhsT_ref.shape[1]
        dn = (((1,), (0,)), ((), ()))           # (tr,D) @ (D,cw): MXU-native
        for c0 in range(0, ncol, col_tile):
            cw = min(col_tile, ncol - c0)
            s = jax.lax.dot_general(lhs_half, rhsT_ref[:, c0:c0 + cw], dn,
                                    preferred_element_type=jnp.float32)
            # Shift-stabilized softmax: s <= gamma == shift so exp(s-shift)<=1;
            # the shift cancels exactly in sum(e*s)/sum(e).
            e = jnp.exp(s - shift)
            acc_ref[e_slot] += jnp.sum(e)
            acc_ref[es_slot] += jnp.sum(e * s)
        # TODO(synk): defer the per-step cross-lane collapse by accumulating
        # into a vreg-shaped VMEM accumulator and reducing once at i==last.

    # Skip all-padding halves entirely (no wasted EUP work on zero rows).
    @pl.when(tile0 < nu)
    def _up_half():
        xu = normalize_half(0)
        accumulate(xu, ppT_ref, 0, 1)           # p2p
        accumulate(xu, pnT_ref, 4, 5)           # p2n

    @pl.when(tile0 < nn)
    def _un_half():
        accumulate(normalize_half(1), ppT_ref, 2, 3)   # n2p

    @pl.when(i == last)
    def _finalize():
        for k in range(6):
            out_ref[0, k] = acc_ref[k]


def triplet_mul_loss(utt_pos, per_pos, utt_neg, per_neg,
                     alpha=ALPHA, gamma=GAMMA, eps=EPS,
                     max_row_tile=256, col_tile=512):
    Nu, D = utt_pos.shape
    Np = per_pos.shape[0]
    Nn = utt_neg.shape[0]
    Nm = per_neg.shape[0]

    dtype = utt_pos.dtype
    itemsize = jnp.dtype(dtype).itemsize
    sub = max(8, 32 // itemsize)      # sublane tile: 8 f32 / 16 bf16 / 32 int8

    # Row-tile the stacked LHS; pad to num_splits * tiles_per_split tiles so
    # the row-tile loop can be sharded across both v7x TensorCores.
    base = max(Nu, Nn)
    tr = max(sub, _round_up(min(max_row_tile, base), sub))
    tiles_needed = _cdiv(base, tr)
    num_splits = 2 if tiles_needed >= 2 else 1
    tiles_per_split = _cdiv(tiles_needed, num_splits)
    total_tiles = num_splits * tiles_per_split
    P = total_tiles * tr

    up = jnp.pad(utt_pos, ((0, P - Nu), (0, 0))) if Nu != P else utt_pos
    un = jnp.pad(utt_neg, ((0, P - Nn), (0, 0))) if Nn != P else utt_neg
    stacked = jnp.stack([up, un], axis=0)                        # (2, P, D)

    # Row-normalize the resident RHS once in the wrapper (XLA-fused) and hand
    # it to the kernel transposed, (D, N): lane-dense, MXU-native, and only a
    # single VMEM copy (no raw + normalized-scratch duplication).
    def _normalize_t(m):
        mf = m.astype(jnp.float32)
        ssq = jnp.sum(mf * mf, axis=1, keepdims=True)
        inv = jax.lax.rsqrt(jnp.maximum(ssq, eps * eps))
        return jnp.transpose(mf * inv).astype(m.dtype)           # (D, N)

    ppT = _normalize_t(per_pos)
    pnT = _normalize_t(per_neg)

    shift = float(gamma)   # s = gamma * cos <= gamma, so exp(s - shift) <= 1

    kernel = functools.partial(
        _triplet_kernel,
        gamma=float(gamma), eps=float(eps), shift=shift,
        nu=Nu, nn=Nn, tr=tr, tiles_per_split=tiles_per_split,
        col_tile=int(col_tile))

    grid_spec = pltpu.PrefetchScalarGridSpec(
        num_scalar_prefetch=0,
        grid=(num_splits, tiles_per_split),
        in_specs=[
            pl.BlockSpec((2, tr, D),
                         lambda c, i: (0, c * tiles_per_split + i, 0)),
            pl.BlockSpec((D, Np), lambda c, i: (0, 0)),   # resident per_pos^T
            pl.BlockSpec((D, Nm), lambda c, i: (0, 0)),   # resident per_neg^T
        ],
        out_specs=pl.BlockSpec((1, 6), lambda c, i: (c, 0),
                               memory_space=pltpu.SMEM),
        scratch_shapes=[pltpu.SMEM((6,), jnp.float32)],
    )

    # Per-generation VMEM budget: ~85% of physical capacity (uses v5e/v6e's
    # larger VMEM, leaves compiler headroom on v7x's 64 MiB).
    cap = 64 << 20
    try:
        cap = int(getattr(pltpu.get_tpu_info(), "vmem_capacity_bytes", cap))
    except Exception:
        pass
    budget = int(cap * 0.85)
    cw_max = max(min(col_tile, Np), min(col_tile, Nm))
    vmem_est = (2 * (2 * tr * D) * itemsize           # double-buffered LHS tile
                + 2 * (Np + Nm) * D * itemsize        # resident RHS blocks
                + 2 * tr * D * 4                      # normalized LHS (f32)
                + 4 * tr * cw_max * 4                 # s / e chunk temporaries
                + (4 << 20))                          # headroom
    vmem_limit = int(min(max(vmem_est, 16 << 20), budget))
    # TODO(synk): also pipeline per_pos/per_neg column blocks from HBM (extra
    # grid axis) when the persona matrices themselves exceed the VMEM budget.

    parts = pl.pallas_call(
        kernel,
        out_shape=jax.ShapeDtypeStruct((num_splits, 6), jnp.float32),
        grid_spec=grid_spec,
        compiler_params=pltpu.CompilerParams(
            dimension_semantics=("parallel", "arbitrary"),
            vmem_limit_bytes=vmem_limit),
    )(stacked, ppT, pnT)

    sums = jnp.sum(parts, axis=0)                                # (6,)

    # Padded-but-processed zero rows contribute exp(0 - shift) to sum(e) and 0
    # to sum(e*s); subtract the statically-known correction.  Fully padded
    # tiles were skipped in-kernel and need no correction.
    e0 = math.exp(-shift)
    pad_up = _cdiv(Nu, tr) * tr - Nu
    pad_un = _cdiv(Nn, tr) * tr - Nn
    p2p = sums[1] / (sums[0] - pad_up * Np * e0)
    n2p = sums[3] / (sums[2] - pad_un * Np * e0)
    p2n = sums[5] / (sums[4] - pad_up * Nm * e0)

    return (jnp.maximum(0.0, alpha - p2p + n2p)
            + jnp.maximum(0.0, alpha - p2p + p2n))


def _reference(utt_pos, per_pos, utt_neg, per_neg,
               alpha=ALPHA, gamma=GAMMA, eps=EPS):
    # Faithful JAX transcription of the PyTorch module.
    def pc(m1, m2):
        w1 = jnp.linalg.norm(m1, axis=1, keepdims=True)
        w2 = jnp.linalg.norm(m2, axis=1, keepdims=True)
        return (m1 @ m2.T) / jnp.maximum(w1 * w2.T, eps)

    def mi(s):
        e = jnp.exp(s)
        return jnp.sum(e / jnp.sum(e) * s)

    p2p = mi(gamma * pc(utt_pos, per_pos))
    n2p = mi(gamma * pc(utt_neg, per_pos))
    p2n = mi(gamma * pc(utt_pos, per_neg))
    return (jnp.maximum(0.0, alpha - p2p + n2p)
            + jnp.maximum(0.0, alpha - p2p + p2n))


if __name__ == "__main__":
    root = jax.random.PRNGKey(0)
    D = 32

    def make(idx, shapes):
        ks = jax.random.split(jax.random.fold_in(root, idx), 4)
        return [jax.random.normal(k, s, dtype=jnp.float32)
                for k, s in zip(ks, shapes)]

    cases = [
        # (inputs, extra kwargs)
        (make(0, ((8, D), (8, D), (8, D), (8, D))), {}),                  # basic
        (make(1, ((8, D), (16, D), (24, D), (8, D))), {}),                # ragged rows (padding/skip path)
        (make(2, ((40, D), (16, D), (40, D), (16, D))), {"max_row_tile": 16}),  # multi-tile, 2-way parallel split
    ]

    for idx, (args, kw) in enumerate(cases):
        loss = jax.block_until_ready(triplet_mul_loss(*args, **kw))
        ref = _reference(*args)
        # Tolerance absorbs matmul precision / reduction-order differences
        # between the in-kernel (row-normalized, shift-stabilized) and
        # reference formulations.
        assert jnp.allclose(loss, ref, atol=5e-4, rtol=5e-4), (idx, loss, ref)

    print("KERNEL_OK")
</pallas_src>

<mosaic_0001>
module attributes {stable_mosaic.version = 11 : i64} {
  func.func @_triplet_kernel(%arg0: i32, %arg1: i32, %arg2: memref<2x8x32xf32, #tpu.memory_space<vmem>>, %arg3: memref<32x8xf32, #tpu.memory_space<vmem>>, %arg4: memref<32x8xf32, #tpu.memory_space<vmem>>, %arg5: memref<1x6xf32, #tpu.memory_space<smem>>, %arg6: memref<6xf32, #tpu.memory_space<smem>>) attributes {dimension_semantics = [#tpu.dimension_semantics<parallel>, #tpu.dimension_semantics<arbitrary>], iteration_bounds = array<i64: 1, 1>, scalar_prefetch = 0 : i64, scratch_operands = 1 : i64, tpu.core_type = #tpu.core_type<tc>, window_params = [{transform_indices = @transform_0, window_bounds = array<i64: 2, 8, 32>}, {pipeline_mode = #tpu.pipeline_mode<synchronous>, transform_indices = @transform_1, window_bounds = array<i64: 32, 8>}, {pipeline_mode = #tpu.pipeline_mode<synchronous>, transform_indices = @transform_2, window_bounds = array<i64: 32, 8>}, {transform_indices = @transform_3, window_bounds = array<i64: 1, 6>}]} {
    %c1_i32 = arith.constant 1 : i32
    %0 = arith.muli %arg0, %c1_i32 : i32
    %1 = arith.addi %0, %arg1 : i32
    %c8_i32 = arith.constant 8 : i32
    %2 = arith.muli %1, %c8_i32 : i32
    %c0_i32 = arith.constant 0 : i32
    %3 = arith.cmpi eq, %arg1, %c0_i32 : i32
    %4 = arith.extui %3 : i1 to i32
    %c0_i32_0 = arith.constant 0 : i32
    %5 = arith.cmpi ne, %4, %c0_i32_0 : i32
    scf.if %5 {
      %cst = arith.constant 0.000000e+00 : f32
      %c0 = arith.constant 0 : index
      %15 = memref.load %arg6[%c0] : memref<6xf32, #tpu.memory_space<smem>>
      memref.store %cst, %arg6[%c0] : memref<6xf32, #tpu.memory_space<smem>>
      %cst_7 = arith.constant 0.000000e+00 : f32
      %c1 = arith.constant 1 : index
      %16 = memref.load %arg6[%c1] : memref<6xf32, #tpu.memory_space<smem>>
      memref.store %cst_7, %arg6[%c1] : memref<6xf32, #tpu.memory_space<smem>>
      %cst_8 = arith.constant 0.000000e+00 : f32
      %c2 = arith.constant 2 : index
      %17 = memref.load %arg6[%c2] : memref<6xf32, #tpu.memory_space<smem>>
      memref.store %cst_8, %arg6[%c2] : memref<6xf32, #tpu.memory_space<smem>>
      %cst_9 = arith.constant 0.000000e+00 : f32
      %c3 = arith.constant 3 : index
      %18 = memref.load %arg6[%c3] : memref<6xf32, #tpu.memory_space<smem>>
      memref.store %cst_9, %arg6[%c3] : memref<6xf32, #tpu.memory_space<smem>>
      %cst_10 = arith.constant 0.000000e+00 : f32
      %c4 = arith.constant 4 : index
      %19 = memref.load %arg6[%c4] : memref<6xf32, #tpu.memory_space<smem>>
      memref.store %cst_10, %arg6[%c4] : memref<6xf32, #tpu.memory_space<smem>>
      %cst_11 = arith.constant 0.000000e+00 : f32
      %c5 = arith.constant 5 : index
      %20 = memref.load %arg6[%c5] : memref<6xf32, #tpu.memory_space<smem>>
      memref.store %cst_11, %arg6[%c5] : memref<6xf32, #tpu.memory_space<smem>>
    } else {
    }
    %c8_i32_1 = arith.constant 8 : i32
    %6 = arith.cmpi slt, %2, %c8_i32_1 : i32
    %7 = arith.extui %6 : i1 to i32
    %c0_i32_2 = arith.constant 0 : i32
    %8 = arith.cmpi ne, %7, %c0_i32_2 : i32
    scf.if %8 {
      %c0 = arith.constant 0 : index
      %c0_7 = arith.constant 0 : index
      %c0_8 = arith.constant 0 : index
      %15 = vector.load %arg2[%c0, %c0_7, %c0_8] : memref<2x8x32xf32, #tpu.memory_space<vmem>>, vector<1x8x32xf32>
      %16 = vector.shape_cast %15 : vector<1x8x32xf32> to vector<8x32xf32>
      %17 = arith.mulf %16, %16 : vector<8x32xf32>
      %cst = arith.constant dense<0.000000e+00> : vector<8xf32>
      %18 = vector.multi_reduction <add>, %17, %cst [1] : vector<8x32xf32> to vector<8xf32>
      %19 = vector.shape_cast %18 : vector<8xf32> to vector<8x1xf32>
      %cst_9 = arith.constant 9.99999996E-13 : f32
      %20 = vector.broadcast %cst_9 : f32 to vector<8x1xf32>
      %21 = arith.maximumf %19, %20 : vector<8x1xf32>
      %22 = math.rsqrt %21 : vector<8x1xf32>
      %cst_10 = arith.constant 1.000000e+00 : f32
      %23 = vector.broadcast %cst_10 : f32 to vector<8x1xf32>
      %24 = arith.mulf %22, %23 : vector<8x1xf32>
      %25 = vector.broadcast %24 : vector<8x1xf32> to vector<8x32xf32>
      %26 = arith.mulf %16, %25 : vector<8x32xf32>
      %c0_11 = arith.constant 0 : index
      %c0_12 = arith.constant 0 : index
      %27 = vector.load %arg3[%c0_11, %c0_12] : memref<32x8xf32, #tpu.memory_space<vmem>>, vector<32x8xf32>
      %cst_13 = arith.constant dense<0.000000e+00> : vector<8x8xf32>
      %28 = tpu.matmul %26, %27, %cst_13 {dimension_numbers = #tpu.dot_dimension_numbers<[1], [0], [0], [1], [0, 0, 1, 1], [], []>} : vector<8x32xf32>, vector<32x8xf32>, vector<8x8xf32> -> vector<8x8xf32>
      %cst_14 = arith.constant 1.000000e+00 : f32
      %29 = vector.broadcast %cst_14 : f32 to vector<8x8xf32>
      %30 = arith.subf %28, %29 : vector<8x8xf32>
      %31 = math.exp %30 : vector<8x8xf32>
      %c0_15 = arith.constant 0 : index
      %32 = memref.load %arg6[%c0_15] : memref<6xf32, #tpu.memory_space<smem>>
      %33 = vector.shape_cast %31 : vector<8x8xf32> to vector<1x8x8xf32>
      %cst_16 = arith.constant dense<0.000000e+00> : vector<1xf32>
      %34 = vector.multi_reduction <add>, %33, %cst_16 [1, 2] : vector<1x8x8xf32> to vector<1xf32>
      %35 = vector.shape_cast %34 : vector<1xf32> to vector<1x1x1xf32>
      %36 = vector.extract %35[0, 0, 0] : f32 from vector<1x1x1xf32>
      %37 = arith.addf %32, %36 : f32
      %c0_17 = arith.constant 0 : index
      %38 = memref.load %arg6[%c0_17] : memref<6xf32, #tpu.memory_space<smem>>
      memref.store %37, %arg6[%c0_17] : memref<6xf32, #tpu.memory_space<smem>>
      %c1 = arith.constant 1 : index
      %39 = memref.load %arg6[%c1] : memref<6xf32, #tpu.memory_space<smem>>
      %40 = arith.mulf %31, %28 : vector<8x8xf32>
      %41 = vector.shape_cast %40 : vector<8x8xf32> to vector<1x8x8xf32>
      %cst_18 = arith.constant dense<0.000000e+00> : vector<1xf32>
      %42 = vector.multi_reduction <add>, %41, %cst_18 [1, 2] : vector<1x8x8xf32> to vector<1xf32>
      %43 = vector.shape_cast %42 : vector<1xf32> to vector<1x1x1xf32>
      %44 = vector.extract %43[0, 0, 0] : f32 from vector<1x1x1xf32>
      %45 = arith.addf %39, %44 : f32
      %c1_19 = arith.constant 1 : index
      %46 = memref.load %arg6[%c1_19] : memref<6xf32, #tpu.memory_space<smem>>
      memref.store %45, %arg6[%c1_19] : memref<6xf32, #tpu.memory_space<smem>>
      %c0_20 = arith.constant 0 : index
      %c0_21 = arith.constant 0 : index
      %47 = vector.load %arg4[%c0_20, %c0_21] : memref<32x8xf32, #tpu.memory_space<vmem>>, vector<32x8xf32>
      %cst_22 = arith.constant dense<0.000000e+00> : vector<8x8xf32>
      %48 = tpu.matmul %26, %47, %cst_22 {dimension_numbers = #tpu.dot_dimension_numbers<[1], [0], [0], [1], [0, 0, 1, 1], [], []>} : vector<8x32xf32>, vector<32x8xf32>, vector<8x8xf32> -> vector<8x8xf32>
      %cst_23 = arith.constant 1.000000e+00 : f32
      %49 = vector.broadcast %cst_23 : f32 to vector<8x8xf32>
      %50 = arith.subf %48, %49 : vector<8x8xf32>
      %51 = math.exp %50 : vector<8x8xf32>
      %c4 = arith.constant 4 : index
      %52 = memref.load %arg6[%c4] : memref<6xf32, #tpu.memory_space<smem>>
      %53 = vector.shape_cast %51 : vector<8x8xf32> to vector<1x8x8xf32>
      %cst_24 = arith.constant dense<0.000000e+00> : vector<1xf32>
      %54 = vector.multi_reduction <add>, %53, %cst_24 [1, 2] : vector<1x8x8xf32> to vector<1xf32>
      %55 = vector.shape_cast %54 : vector<1xf32> to vector<1x1x1xf32>
      %56 = vector.extract %55[0, 0, 0] : f32 from vector<1x1x1xf32>
      %57 = arith.addf %52, %56 : f32
      %c4_25 = arith.constant 4 : index
      %58 = memref.load %arg6[%c4_25] : memref<6xf32, #tpu.memory_space<smem>>
      memref.store %57, %arg6[%c4_25] : memref<6xf32, #tpu.memory_space<smem>>
      %c5 = arith.constant 5 : index
      %59 = memref.load %arg6[%c5] : memref<6xf32, #tpu.memory_space<smem>>
      %60 = arith.mulf %51, %48 : vector<8x8xf32>
      %61 = vector.shape_cast %60 : vector<8x8xf32> to vector<1x8x8xf32>
      %cst_26 = arith.constant dense<0.000000e+00> : vector<1xf32>
      %62 = vector.multi_reduction <add>, %61, %cst_26 [1, 2] : vector<1x8x8xf32> to vector<1xf32>
      %63 = vector.shape_cast %62 : vector<1xf32> to vector<1x1x1xf32>
      %64 = vector.extract %63[0, 0, 0] : f32 from vector<1x1x1xf32>
      %65 = arith.addf %59, %64 : f32
      %c5_27 = arith.constant 5 : index
      %66 = memref.load %arg6[%c5_27] : memref<6xf32, #tpu.memory_space<smem>>
      memref.store %65, %arg6[%c5_27] : memref<6xf32, #tpu.memory_space<smem>>
    } else {
    }
    %c8_i32_3 = arith.constant 8 : i32
    %9 = arith.cmpi slt, %2, %c8_i32_3 : i32
    %10 = arith.extui %9 : i1 to i32
    %c0_i32_4 = arith.constant 0 : i32
    %11 = arith.cmpi ne, %10, %c0_i32_4 : i32
    scf.if %11 {
      %c1 = arith.constant 1 : index
      %c0 = arith.constant 0 : index
      %c0_7 = arith.constant 0 : index
      %15 = vector.load %arg2[%c1, %c0, %c0_7] : memref<2x8x32xf32, #tpu.memory_space<vmem>>, vector<1x8x32xf32>
      %16 = vector.shape_cast %15 : vector<1x8x32xf32> to vector<8x32xf32>
      %17 = arith.mulf %16, %16 : vector<8x32xf32>
      %cst = arith.constant dense<0.000000e+00> : vector<8xf32>
      %18 = vector.multi_reduction <add>, %17, %cst [1] : vector<8x32xf32> to vector<8xf32>
      %19 = vector.shape_cast %18 : vector<8xf32> to vector<8x1xf32>
      %cst_8 = arith.constant 9.99999996E-13 : f32
      %20 = vector.broadcast %cst_8 : f32 to vector<8x1xf32>
      %21 = arith.maximumf %19, %20 : vector<8x1xf32>
      %22 = math.rsqrt %21 : vector<8x1xf32>
      %cst_9 = arith.constant 1.000000e+00 : f32
      %23 = vector.broadcast %cst_9 : f32 to vector<8x1xf32>
      %24 = arith.mulf %22, %23 : vector<8x1xf32>
      %25 = vector.broadcast %24 : vector<8x1xf32> to vector<8x32xf32>
      %26 = arith.mulf %16, %25 : vector<8x32xf32>
      %c0_10 = arith.constant 0 : index
      %c0_11 = arith.constant 0 : index
      %27 = vector.load %arg3[%c0_10, %c0_11] : memref<32x8xf32, #tpu.memory_space<vmem>>, vector<32x8xf32>
      %cst_12 = arith.constant dense<0.000000e+00> : vector<8x8xf32>
      %28 = tpu.matmul %26, %27, %cst_12 {dimension_numbers = #tpu.dot_dimension_numbers<[1], [0], [0], [1], [0, 0, 1, 1], [], []>} : vector<8x32xf32>, vector<32x8xf32>, vector<8x8xf32> -> vector<8x8xf32>
      %cst_13 = arith.constant 1.000000e+00 : f32
      %29 = vector.broadcast %cst_13 : f32 to vector<8x8xf32>
      %30 = arith.subf %28, %29 : vector<8x8xf32>
      %31 = math.exp %30 : vector<8x8xf32>
      %c2 = arith.constant 2 : index
      %32 = memref.load %arg6[%c2] : memref<6xf32, #tpu.memory_space<smem>>
      %33 = vector.shape_cast %31 : vector<8x8xf32> to vector<1x8x8xf32>
      %cst_14 = arith.constant dense<0.000000e+00> : vector<1xf32>
      %34 = vector.multi_reduction <add>, %33, %cst_14 [1, 2] : vector<1x8x8xf32> to vector<1xf32>
      %35 = vector.shape_cast %34 : vector<1xf32> to vector<1x1x1xf32>
      %36 = vector.extract %35[0, 0, 0] : f32 from vector<1x1x1xf32>
      %37 = arith.addf %32, %36 : f32
      %c2_15 = arith.constant 2 : index
      %38 = memref.load %arg6[%c2_15] : memref<6xf32, #tpu.memory_space<smem>>
      memref.store %37, %arg6[%c2_15] : memref<6xf32, #tpu.memory_space<smem>>
      %c3 = arith.constant 3 : index
      %39 = memref.load %arg6[%c3] : memref<6xf32, #tpu.memory_space<smem>>
      %40 = arith.mulf %31, %28 : vector<8x8xf32>
      %41 = vector.shape_cast %40 : vector<8x8xf32> to vector<1x8x8xf32>
      %cst_16 = arith.constant dense<0.000000e+00> : vector<1xf32>
      %42 = vector.multi_reduction <add>, %41, %cst_16 [1, 2] : vector<1x8x8xf32> to vector<1xf32>
      %43 = vector.shape_cast %42 : vector<1xf32> to vector<1x1x1xf32>
      %44 = vector.extract %43[0, 0, 0] : f32 from vector<1x1x1xf32>
      %45 = arith.addf %39, %44 : f32
      %c3_17 = arith.constant 3 : index
      %46 = memref.load %arg6[%c3_17] : memref<6xf32, #tpu.memory_space<smem>>
      memref.store %45, %arg6[%c3_17] : memref<6xf32, #tpu.memory_space<smem>>
    } else {
    }
    %c0_i32_5 = arith.constant 0 : i32
    %12 = arith.cmpi eq, %arg1, %c0_i32_5 : i32
    %13 = arith.extui %12 : i1 to i32
    %c0_i32_6 = arith.constant 0 : i32
    %14 = arith.cmpi ne, %13, %c0_i32_6 : i32
    scf.if %14 {
      %c0 = arith.constant 0 : index
      %15 = memref.load %arg6[%c0] : memref<6xf32, #tpu.memory_space<smem>>
      %c0_7 = arith.constant 0 : index
      %c0_8 = arith.constant 0 : index
      %16 = memref.load %arg5[%c0_7, %c0_8] : memref<1x6xf32, #tpu.memory_space<smem>>
      memref.store %15, %arg5[%c0_7, %c0_8] : memref<1x6xf32, #tpu.memory_space<smem>>
      %c1 = arith.constant 1 : index
      %17 = memref.load %arg6[%c1] : memref<6xf32, #tpu.memory_space<smem>>
      %c0_9 = arith.constant 0 : index
      %c1_10 = arith.constant 1 : index
      %18 = memref.load %arg5[%c0_9, %c1_10] : memref<1x6xf32, #tpu.memory_space<smem>>
      memref.store %17, %arg5[%c0_9, %c1_10] : memref<1x6xf32, #tpu.memory_space<smem>>
      %c2 = arith.constant 2 : index
      %19 = memref.load %arg6[%c2] : memref<6xf32, #tpu.memory_space<smem>>
      %c0_11 = arith.constant 0 : index
      %c2_12 = arith.constant 2 : index
      %20 = memref.load %arg5[%c0_11, %c2_12] : memref<1x6xf32, #tpu.memory_space<smem>>
      memref.store %19, %arg5[%c0_11, %c2_12] : memref<1x6xf32, #tpu.memory_space<smem>>
      %c3 = arith.constant 3 : index
      %21 = memref.load %arg6[%c3] : memref<6xf32, #tpu.memory_space<smem>>
      %c0_13 = arith.constant 0 : index
      %c3_14 = arith.constant 3 : index
      %22 = memref.load %arg5[%c0_13, %c3_14] : memref<1x6xf32, #tpu.memory_space<smem>>
      memref.store %21, %arg5[%c0_13, %c3_14] : memref<1x6xf32, #tpu.memory_space<smem>>
      %c4 = arith.constant 4 : index
      %23 = memref.load %arg6[%c4] : memref<6xf32, #tpu.memory_space<smem>>
      %c0_15 = arith.constant 0 : index
      %c4_16 = arith.constant 4 : index
      %24 = memref.load %arg5[%c0_15, %c4_16] : memref<1x6xf32, #tpu.memory_space<smem>>
      memref.store %23, %arg5[%c0_15, %c4_16] : memref<1x6xf32, #tpu.memory_space<smem>>
      %c5 = arith.constant 5 : index
      %25 = memref.load %arg6[%c5] : memref<6xf32, #tpu.memory_space<smem>>
      %c0_17 = arith.constant 0 : index
      %c5_18 = arith.constant 5 : index
      %26 = memref.load %arg5[%c0_17, %c5_18] : memref<1x6xf32, #tpu.memory_space<smem>>
      memref.store %25, %arg5[%c0_17, %c5_18] : memref<1x6xf32, #tpu.memory_space<smem>>
    } else {
    }
    return
  }
  func.func @transform_0(%arg0: i32, %arg1: i32) -> (i32, i32, i32) {
    %c1_i32 = arith.constant 1 : i32
    %0 = arith.muli %arg0, %c1_i32 : i32
    %1 = arith.addi %0, %arg1 : i32
    %c0_i32 = arith.constant 0 : i32
    %c0_i32_0 = arith.constant 0 : i32
    %c0_i32_1 = arith.constant 0 : i32
    return %c0_i32, %1, %c0_i32_0 : i32, i32, i32
  }
  func.func @transform_1(%arg0: i32, %arg1: i32) -> (i32, i32) {
    %c0_i32 = arith.constant 0 : i32
    %c0_i32_0 = arith.constant 0 : i32
    %c0_i32_1 = arith.constant 0 : i32
    return %c0_i32, %c0_i32_0 : i32, i32
  }
  func.func @transform_2(%arg0: i32, %arg1: i32) -> (i32, i32) {
    %c0_i32 = arith.constant 0 : i32
    %c0_i32_0 = arith.constant 0 : i32
    %c0_i32_1 = arith.constant 0 : i32
    return %c0_i32, %c0_i32_0 : i32, i32
  }
  func.func @transform_3(%arg0: i32, %arg1: i32) -> (i32, i32) {
    %c0_i32 = arith.constant 0 : i32
    %c0_i32_0 = arith.constant 0 : i32
    return %arg0, %c0_i32 : i32, i32
  }
}

</mosaic_0001>

<bundles_post_ra>
// kernel: tpu_custom_call.1
= control target key start
LH: loop header
LB: loop body
LE: loop exit
PB: predicated region body
PF: predicated region fallthrough
CT: control target
= control target key end

     0   :  { %vm56_vm0 = vcmask 261120   ;;  %s607_s0 = inlined_call_operand.vmem [shape: f32[2,8,32], index: 0, kind: input, shape index: {}]   ;;  %s608_s1 = inlined_call_operand.vmem [shape: f32[32,8], index: 1, kind: input, shape index: {}]   ;;  %s609_s2 = inlined_call_operand.vmem [shape: f32[32,8], index: 2, kind: input, shape index: {}]   ;;  %s610_s3 = inlined_call_operand.hbm [shape: f32[1,6], index: 3, kind: output, shape index: {}]  }
   0x1   :  { %v54_v0 = vld [vmem:[%s607_s0] sm:$0xff]  ;;  %v444_v1 = vld [vmem:[%s607_s0 + $0x8] sm:$0xff] }
   0x2   :  { %8 = vsyncpa [#allocation4], 0  ;;  %v55_v2 = vmul.f32 %v54_v0, %v54_v0  ;;  %v281_v3 = vmul.f32 %v444_v1, %v444_v1  ;;  %v66_v6 = vld [vmem:[%s608_s1 + $0x18] sm:$0xff]  ;;  %v537_v8 = vmov 0.0   ;;  %v65_v9 = vld [vmem:[%s608_s1 + $0x10] sm:$0xff]  ;;  %vm538_vm1 = vmmov 0  }
   0x3   :  { %v176_v7 = vld [vmem:[%s609_s2 + $0x18] sm:$0xff]  ;;  %469 = vmatprep.subr.mxu0 %v537_v8  ;;  %480 = vmatprep.subr.mxu1 %v537_v8  ;;  %v175_v10 = vld [vmem:[%s609_s2 + $0x10] sm:$0xff]  ;;  %v64_v11 = vld [vmem:[%s608_s1 + $0x8] sm:$0xff]  ;;  %vm144_vm2 = vcmask 64512   ;;  %s539_s8 = smov [#allocation3]  }
   0x4   :  { %v57_v4 = vsel %vm56_vm0, %v55_v2, 0.0  ;;  %v282_v5 = vsel %vm56_vm0, %v281_v3, 0.0  ;;  %470 = vmatpush3.msra.mxu0 %v66_v6  ;;  %481 = vmatpush3.msra.mxu1 %v176_v7  ;;  %v174_v12 = vld [vmem:[%s609_s2 + $0x8] sm:$0xff]  ;;  %v63_v13 = vld [vmem:[%s608_s1] sm:$0xff] }
   0x5   :  { %58 = vadd.xlane.f32.xlu0 %v57_v4  ;;  %471 = vmatprep.subr.mxu0 %v537_v8  ;;  %v173_v14 = vld [vmem:[%s609_s2] sm:$0xff] }
   0x6   :  { %482 = vmatprep.subr.mxu1 %v537_v8  ;;  %472 = vmatpush3.msra.mxu0 %v65_v9 }
   0x7   :  { %483 = vmatpush3.msra.mxu1 %v175_v10  ;;  %473 = vmatprep.subr.mxu0 %v537_v8 }
   0x8   :  { %484 = vmatprep.subr.mxu1 %v537_v8  ;;  %474 = vmatpush3.msra.mxu0 %v64_v11 }
   0x9   :  { %283 = vadd.xlane.f32.xlu0 %v282_v5  ;;  %485 = vmatpush3.msra.mxu1 %v174_v12 }
   0xa   :  { %475 = vmatprep.subr.mxu0 %v537_v8  ;;  %486 = vmatprep.subr.mxu1 %v537_v8 }
   0xb   :  { %476 = vmatpush3.msra.mxu0 %v63_v13  ;;  %477 = vmatprep.mubr.msk.f32.mxu0 %vm538_vm1, %v537_v8 }
   0xc   :  { %487 = vmatpush3.msra.mxu1 %v173_v14  ;;  %488 = vmatprep.mubr.msk.f32.mxu1 %vm538_vm1, %v537_v8 }
   0xd   :  { %491 = vmatprep.subr.mxu0 %v537_v8 }
  0x8e   :  { %v59_v15 = vpop.xlane.xlu0 %58 }
  0x8f   :  { %v60_v16 = vmax.f32 %v59_v15, 1e-12 }
  0x91   :  { %517 = vrsqrt.f32 %v60_v16 }
  0x92   :  { %v284_v17 = vpop.xlane.xlu0 %283 }
  0x93   :  { %v285_v18 = vmax.f32 %v284_v17, 1e-12 }
  0x95   :  { %519 = vrsqrt.f32 %v285_v18 }
  0x9e   :  { %v518_v19 = vpop.eup %517 }
  0x9f   :  { %v62_v20 = vmul.f32 %v518_v19, %v54_v0 }
  0xa1   :  { %478 = vmatmul.mubr.msk.f32.vlgmr.msra.gmra.mxu0 %vm56_vm0, %v62_v20  ;;  %489 = vmatmul.mubr.msk.f32.vlgmr.msra.gmra.mxu1 %vm56_vm0, %v62_v20 }
  0xa2   :  { %v520_v21 = vpop.eup %519  ;;  %492 = vmatpush3.msra.mxu0 %v66_v6  ;;  %499 = vmatprep.mubr.msk.f32.mxu0 %vm538_vm1, %v537_v8 }
  0xa3   :  { %493 = vmatprep.subr.mxu0 %v537_v8  ;;  %v287_v22 = vmul.f32 %v520_v21, %v444_v1 }
  0xa4   :  { %494 = vmatpush3.msra.mxu0 %v65_v9 }
  0xa5   :  { %495 = vmatprep.subr.mxu0 %v537_v8 }
  0xa6   :  { %496 = vmatpush3.msra.mxu0 %v64_v11 }
  0xa7   :  { %497 = vmatprep.subr.mxu0 %v537_v8 }
  0xa8   :  { %498 = vmatpush3.msra.mxu0 %v63_v13 }
  0xa9   :  { %500 = vmatmul.mubr.msk.f32.vlgmr.msra.gmra.mxu0 %vm56_vm0, %v287_v22 }
 0x161   :  { %v136_v23 = vpop.f32.mrf.mxu0  ;;  %v243_v24 = vpop.f32.mrf.mxu1 }
 0x162   :  { %v438_v25 = vadd.f32 -1.0, %v136_v23  ;;  %v441_v26 = vadd.f32 -1.0, %v243_v24 }
 0x163   :  { %v479_v27 = vpop.f32.mrf.mxu0  ;;  %v490_v28 = vpop.f32.mrf.mxu1 }
 0x164   :  { %v141_v29 = vmul.f32 1.442695, %v438_v25  ;;  %v248_v30 = vmul.f32 1.442695, %v441_v26 }
 0x166   :  { %521 = vpow2.f32 %v141_v29 }
 0x167   :  { %523 = vpow2.f32 %v248_v30 }
 0x169   :  { %v361_v31 = vpop.f32.mrf.mxu0 }
 0x16a   :  { %v446_v32 = vadd.f32 -1.0, %v361_v31 }
 0x16b   :  { %v501_v33 = vpop.f32.mrf.mxu0 }
 0x16c   :  { %v366_v34 = vmul.f32 1.442695, %v446_v32 }
 0x16e   :  { %525 = vpow2.f32 %v366_v34 }
 0x173   :  { %v522_v35 = vpop.eup %521 }
 0x174   :  { %v524_v36 = vpop.eup %523  ;;  %v159_v37 = vmul.f32 %v522_v35, %v136_v23  ;;  %v145_v38 = vsel %vm144_vm2, %v522_v35, 0.0 }
 0x175   :  { %v251_v39 = vsel %vm144_vm2, %v524_v36, 0.0  ;;  %146 = vadd.xlane.f32.xlu1 %v145_v38  ;;  %v265_v40 = vmul.f32 %v524_v36, %v243_v24 }
 0x176   :  { %252 = vadd.xlane.f32.xlu0 %v251_v39  ;;  %v160_v41 = vsel %vm144_vm2, %v159_v37, 0.0 }
 0x177   :  { %v266_v45 = vsel %vm144_vm2, %v265_v40, 0.0 }
 0x179   :  { %161 = vadd.xlane.f32.xlu1 %v160_v41 }
 0x17b   :  { %v526_v42 = vpop.eup %525 }
 0x17c   :  { %v383_v43 = vmul.f32 %v526_v42, %v361_v31  ;;  %v369_v44 = vsel %vm144_vm2, %v526_v42, 0.0 }
 0x17d   :  { %370 = vadd.xlane.f32.xlu0 %v369_v44  ;;  %267 = vadd.xlane.f32.xlu1 %v266_v45 }
 0x17e   :  { %v384_v46 = vsel %vm144_vm2, %v383_v43, 0.0 }
 0x181   :  { %385 = vadd.xlane.f32.xlu1 %v384_v46 }
 0x1fe   :  { %v147_v47 = vpop.xlane.xlu1 %146 }
 0x1ff   :  { %v148_v48 = vrot.slane %v147_v47, 4  ;;  %v253_v49 = vpop.xlane.xlu0 %252 }
 0x200   :  { %v254_v50 = vrot.slane %v253_v49, 4 }
 0x201   :  { %v149_v51 = vadd.f32 %v148_v48, %v147_v47 }
 0x202   :  { %v255_v52 = vadd.f32 %v254_v50, %v253_v49  ;;  %v162_v53 = vpop.xlane.xlu1 %161 }
 0x203   :  { %v150_v54 = vrot.slane %v149_v51, 2  ;;  %v163_v55 = vrot.slane %v162_v53, 4 }
 0x204   :  { %v256_v56 = vrot.slane %v255_v52, 2 }
 0x205   :  { %v164_v57 = vadd.f32 %v163_v55, %v162_v53  ;;  %v151_v58 = vadd.f32 %v150_v54, %v149_v51 }
 0x206   :  { %v371_v59 = vpop.xlane.xlu0 %370  ;;  %v268_v60 = vpop.xlane.xlu1 %267  ;;  %v257_v61 = vadd.f32 %v256_v56, %v255_v52 }
 0x207   :  { %v165_v62 = vrot.slane %v164_v57, 2  ;;  %v372_v63 = vrot.slane %v371_v59, 4  ;;  %v269_v0 = vrot.slane %v268_v60, 4  ;;  %v152_v1 = vrot.slane %v151_v58, 1 }
 0x208   :  { %v258_v7 = vrot.slane %v257_v61, 1 }
 0x209   :  { %v373_v2 = vadd.f32 %v372_v63, %v371_v59  ;;  %v270_v3 = vadd.f32 %v269_v0, %v268_v60  ;;  %v153_v4 = vadd.f32 %v152_v1, %v151_v58  ;;  %v166_v5 = vadd.f32 %v165_v62, %v164_v57 }
 0x20a   :  { %v386_v6 = vpop.xlane.xlu1 %385  ;;  %v259_v16 = vadd.f32 %v258_v7, %v257_v61 }
 0x20b   :  { %v374_v8 = vrot.slane %v373_v2, 2  ;;  %v271_v9 = vrot.slane %v270_v3, 2  ;;  %v387_v10 = vrot.slane %v386_v6, 4  ;;  %502 = vpush %v153_v4  ;;  %v167_v11 = vrot.slane %v166_v5, 1 }
 0x20d   :  { %v375_v12 = vadd.f32 %v374_v8, %v373_v2  ;;  %v388_v13 = vadd.f32 %v387_v10, %v386_v6  ;;  %v168_v14 = vadd.f32 %v167_v11, %v166_v5  ;;  %v272_v15 = vadd.f32 %v271_v9, %v270_v3 }
 0x20f   :  { %v389_v17 = vrot.slane %v388_v13, 2  ;;  %504 = vpush %v168_v14  ;;  %v273_v18 = vrot.slane %v272_v15, 1  ;;  %v376_v19 = vrot.slane %v375_v12, 1 }
 0x210   :  { %506 = vpush %v259_v16 }
 0x211   :  { %v390_v20 = vadd.f32 %v389_v17, %v388_v13  ;;  %v274_v21 = vadd.f32 %v273_v18, %v272_v15  ;;  %v377_v22 = vadd.f32 %v376_v19, %v375_v12 }
 0x213   :  { %508 = vpush %v274_v21  ;;  %v391_v23 = vrot.slane %v390_v20, 1 }
 0x214   :  { %510 = vpush %v377_v22 }
 0x215   :  { %v392_v24 = vadd.f32 %v391_v23, %v390_v20 }
 0x217   :  { %512 = vpush %v392_v24 }
 0x23c   :  { %s503_s1 = spop %502 }
 0x23d   :  { %402 = sst [smem:[#allocation3]] %s503_s1 }
 0x240   :  { %s505_s2 = spop %504 }
 0x241   :  { %405 = sst [smem:[#allocation3 + $0x1]] %s505_s2  ;;  %s507_s4 = spop %506 }
 0x242   :  { %414 = sst [smem:[#allocation3 + $0x4]] %s507_s4 }
 0x244   :  { %s509_s5 = spop %508 }
 0x245   :  { %417 = sst [smem:[#allocation3 + $0x5]] %s509_s5  ;;  %s511_s6 = spop %510 }
 0x246   :  { %408 = sst [smem:[#allocation3 + $0x2]] %s511_s6 }
 0x248   :  { %s513_s7 = spop %512 }
 0x249   :  { %411 = sst [smem:[#allocation3 + $0x3]] %s513_s7 }
 0x24a   :  { %425 = dma.smem_to_hbm %s539_s8, 16, %s610_s3, [#allocation4]  }
 0x24b   :  { %535 = dma.done.wait [#allocation4], 16  }
 0x24c   :  { %536 = vsyncadd [#allocation4], 4294967280 }
 0x24d   :  { %429 = sfence }
 0x24e   :  { %430 = vsyncpa [#allocation4], 1 }

</bundles_post_ra>
